<compile_context>
chip_gen: v7x
topology: tpu7x:2x2x1
jax: 0.10.0
libtpu: 0.0.40
codegen_flags: <defaults>
</compile_context>

<pallas_src>
import functools

import jax
import jax.numpy as jnp
from jax import lax
from jax.experimental import pallas as pl
from jax.experimental.pallas import tpu as pltpu


def self_attention_kernel(xq_ref, xf_ref, wq_ref, bq_ref, wk_ref, bk_ref,
                          wv_ref, bv_ref, gamma_ref, o_ref, k_scr, v_scr):
    # Blocks (leading batch dim indexed away with [0]):
    #   xq_ref: (1, C, TQ) f32   query-tile columns of x (also residual input)
    #   xf_ref: (1, C, N)  bf16  full image for this batch (K/V source)
    #   k_scr : (Cq, N)    bf16  scratch, persists across the query-tile axis
    #   v_scr : (C,  N)    bf16  scratch
    qt = pl.program_id(2)

    # K/V projections once per (batch, split); the query-tile axis is
    # "arbitrary", so the scratch stays valid for all subsequent tiles.
    @pl.when(qt == 0)
    def _():
        x_f = xf_ref[0]                                              # (C, N) bf16
        k_t = jnp.dot(wk_ref[...], x_f,
                      preferred_element_type=jnp.float32) + bk_ref[...]   # (Cq, N) f32
        v_t = jnp.dot(wv_ref[...], x_f,
                      preferred_element_type=jnp.float32) + bv_ref[...]   # (C,  N) f32
        k_scr[...] = k_t.astype(jnp.bfloat16)
        v_scr[...] = v_t.astype(jnp.bfloat16)

    x_q = xq_ref[0]                                                  # (C, TQ) f32
    xq_b = x_q.astype(jnp.bfloat16)

    # q directly in (TQ, Cq): contract the channel axis of x with Wq's input
    # axis -- no transpose of the q tile needed afterwards.
    q = lax.dot_general(
        xq_b, wq_ref[...],
        dimension_numbers=(((0,), (1,)), ((), ())),
        preferred_element_type=jnp.float32) + bq_ref[...]            # (TQ, Cq) f32

    # energy[i, j] = q_i . k_j   == torch.bmm(query.permute(0,2,1), key)
    energy = jnp.dot(q.astype(jnp.bfloat16), k_scr[...],
                     preferred_element_type=jnp.float32)             # (TQ, N) f32

    # Softmax over keys (dim = -1).  Normalization is applied after the PV
    # matmul (column scale of the small (C, TQ) result instead of the big
    # (TQ, N) probability tile).
    m = jnp.max(energy, axis=-1, keepdims=True)
    e = jnp.exp(energy - m)                                          # (TQ, N) f32
    inv_s = pl.reciprocal(jnp.sum(e, axis=-1, keepdims=True),
                          approx=True)                               # (TQ, 1) f32

    # out^T[c, i] = (sum_j v^T[c, j] * e[i, j]) * inv_s[i]
    #   == torch.bmm(value, attention.permute(0,2,1)) in (C, N) layout.
    out_t = lax.dot_general(
        v_scr[...], e.astype(jnp.bfloat16),
        dimension_numbers=(((1,), (1,)), ((), ())),
        preferred_element_type=jnp.float32)                          # (C, TQ) f32
    out_t = out_t * jnp.transpose(inv_s)                             # (1, TQ) col scale

    gamma = gamma_ref[0, 0]                                          # SMEM scalar
    # f32 residual; (C, TQ) store is lane-dense (TQ multiple of 128 or == N).
    o_ref[0] = (gamma * out_t + x_q).astype(o_ref.dtype)


def _vmem_capacity_bytes():
    """Per-core VMEM capacity; conservative fallback if the query fails."""
    try:
        return int(pltpu.get_tpu_info().vmem_capacity_bytes)
    except Exception:
        return 64 * 1024 * 1024            # v7x per-TC (smallest current gen)


def _choose_tq(n, budget_bytes):
    """Largest divisor of n (preferring multiples of 256 for the v6e/v7x
    256x256 MXU, falling back to 128-multiples) whose ~3 live f32 copies of
    the (tq, n) score tile fit the budget.  Falls back to a single full-width
    tile for small / awkward n."""
    cap_rows = max(128, budget_bytes // (3 * 4 * n))

    def best_multiple(step):
        best, t = 0, step
        while t <= min(n, 4096):
            if n % t == 0 and t <= cap_rows:
                best = t
            t += step
        return best

    t = best_multiple(256)
    if t == 0:
        t = best_multiple(128)
    return t if t > 0 else n


def self_attention(x_nchw, wq, bq, wk, bk, wv, bv, gamma, *, tq=None):
    """x_nchw: (B, C, H, W). wq/wk: (C//8, C), wv: (C, C), biases 1-D, gamma scalar."""
    B, C, H, W = x_nchw.shape
    N = H * W
    Cq = wq.shape[0]

    vmem_cap = _vmem_capacity_bytes()

    # NCHW-native layout: (B, C, N) is a free reshape -- no transposes.
    x_cn = x_nchw.astype(jnp.float32).reshape(B, C, N)
    # K/V source already in bf16 (half the DMA bytes / VMEM of the big input).
    x_kv = x_cn.astype(jnp.bfloat16)

    if tq is None:
        tq = _choose_tq(N, budget_bytes=vmem_cap // 6)
    elif not (tq == N or (N % tq == 0 and tq % 128 == 0)):
        raise ValueError(f"tq={tq} must equal N={N} or be a multiple of 128 "
                         f"dividing N")
    nt = N // tq

    # With the query-tile axis "arbitrary" (K/V scratch), a B == 1 problem
    # would leave v7x's second TensorCore idle; give it an explicit 2-way
    # parallel split of the query tiles (K/V recomputed once per core).
    n_split = 2 if (B == 1 and nt >= 2 and nt % 2 == 0) else 1
    nt_inner = nt // n_split

    # bf16 weights for the MXU; biases / gamma stay f32 (added post-accumulation).
    wq_b = wq.astype(jnp.bfloat16)
    wk_b = wk.astype(jnp.bfloat16)
    wv_b = wv.astype(jnp.bfloat16)
    bq_r = bq.astype(jnp.float32).reshape(1, Cq)     # row bias for (TQ, Cq) q
    bk_c = bk.astype(jnp.float32).reshape(Cq, 1)
    bv_c = bv.astype(jnp.float32).reshape(C, 1)
    gamma_s = jnp.asarray(gamma, jnp.float32).reshape(1, 1)

    qmap = lambda b, s, qi: (b, 0, s * nt_inner + qi)

    out_cn = pl.pallas_call(
        self_attention_kernel,
        out_shape=jax.ShapeDtypeStruct((B, C, N), x_cn.dtype),
        grid_spec=pltpu.PrefetchScalarGridSpec(
            num_scalar_prefetch=0,
            grid=(B, n_split, nt_inner),
            in_specs=[
                pl.BlockSpec((1, C, tq), qmap),                       # x query tile (f32)
                pl.BlockSpec((1, C, N),  lambda b, s, qi: (b, 0, 0)), # x full, bf16 (K/V src)
                pl.BlockSpec((Cq, C),    lambda b, s, qi: (0, 0)),    # Wq
                pl.BlockSpec((1, Cq),    lambda b, s, qi: (0, 0)),    # bq (row)
                pl.BlockSpec((Cq, C),    lambda b, s, qi: (0, 0)),    # Wk
                pl.BlockSpec((Cq, 1),    lambda b, s, qi: (0, 0)),    # bk
                pl.BlockSpec((C, C),     lambda b, s, qi: (0, 0)),    # Wv
                pl.BlockSpec((C, 1),     lambda b, s, qi: (0, 0)),    # bv
                pl.BlockSpec(memory_space=pltpu.MemorySpace.SMEM),    # gamma (scalar)
            ],
            out_specs=pl.BlockSpec((1, C, tq), qmap),
            scratch_shapes=[
                pltpu.VMEM((Cq, N), jnp.bfloat16),                    # K^T scratch
                pltpu.VMEM((C, N), jnp.bfloat16),                     # V^T scratch
            ],
        ),
        compiler_params=pltpu.CompilerParams(
            dimension_semantics=("parallel", "parallel", "arbitrary"),
            vmem_limit_bytes=int(vmem_cap * 3 // 4)),
    )(x_cn, x_kv, wq_b, bq_r, wk_b, bk_c, wv_b, bv_c, gamma_s)

    # (B, C, N) -> (B, C, H, W): free reshape, no transpose.
    return out_cn.reshape(B, C, H, W)


def _reference(x, wq, bq, wk, bk, wv, bv, gamma):
    """Pure-JAX f32 reference mirroring the PyTorch forward exactly (NCHW)."""
    B, C, H, W = x.shape
    N = H * W
    xf = x.reshape(B, C, N)                                     # (B, C, N)
    q = jnp.einsum('oc,bcn->bon', wq, xf) + bq[None, :, None]   # (B, Cq, N)
    k = jnp.einsum('oc,bcn->bon', wk, xf) + bk[None, :, None]   # (B, Cq, N)
    v = jnp.einsum('oc,bcn->bon', wv, xf) + bv[None, :, None]   # (B, C, N)
    energy = jnp.einsum('bdi,bdj->bij', q, k)                   # (B, N, N)
    attn = jax.nn.softmax(energy, axis=-1)
    out = jnp.einsum('bcj,bij->bci', v, attn)                   # (B, C, N)
    return gamma * out.reshape(B, C, H, W) + x


if __name__ == "__main__":
    B, C, H, W = 2, 32, 16, 16          # in_channels=32 -> C//8 = 4, N = 256
    Cq = C // 8

    key = jax.random.PRNGKey(0)
    kx, kq, kk, kv, kbq, kbk, kbv = jax.random.split(key, 7)

    x = jax.random.normal(kx, (B, C, H, W), dtype=jnp.float32)
    wq = jax.random.normal(kq, (Cq, C), dtype=jnp.float32) * 0.1
    wk = jax.random.normal(kk, (Cq, C), dtype=jnp.float32) * 0.1
    wv = jax.random.normal(kv, (C, C), dtype=jnp.float32) * 0.1
    bq = jax.random.normal(kbq, (Cq,), dtype=jnp.float32) * 0.01
    bk = jax.random.normal(kbk, (Cq,), dtype=jnp.float32) * 0.01
    bv = jax.random.normal(kbv, (C,), dtype=jnp.float32) * 0.01
    # PyTorch inits gamma to 0 (output == x); use a nonzero value so the
    # attention path actually contributes in these synthetic tests.
    gamma = jnp.float32(0.5)

    sa = jax.jit(self_attention, static_argnames=("tq",))

    # 1) tq=128 forces a multi-tile query grid -> exercises K/V scratch reuse
    #    across the "arbitrary" query-tile axis (grid = (2, 1, 2)).
    out = jax.block_until_ready(sa(x, wq, bq, wk, bk, wv, bv, gamma, tq=128))
    ref = _reference(x, wq, bq, wk, bk, wv, bv, gamma)
    assert out.shape == (B, C, H, W)
    # bf16 MXU operands (f32 accumulation) -> compare at bf16-level tolerance.
    assert jnp.allclose(out, ref, atol=3e-2, rtol=3e-2), \
        f"max abs err {jnp.max(jnp.abs(out - ref))}"

    # 2) Auto-selected TQ (256-aligned path, grid = (2, 1, 1)).
    out_auto = jax.block_until_ready(sa(x, wq, bq, wk, bk, wv, bv, gamma))
    assert jnp.allclose(out_auto, ref, atol=3e-2, rtol=3e-2), \
        f"max abs err {jnp.max(jnp.abs(out_auto - ref))}"

    # 3) B == 1: exercises the 2-way parallel query-tile split (grid = (1, 2, 1)).
    x1 = x[:1]
    out1 = jax.block_until_ready(sa(x1, wq, bq, wk, bk, wv, bv, gamma, tq=128))
    ref1 = _reference(x1, wq, bq, wk, bk, wv, bv, gamma)
    assert jnp.allclose(out1, ref1, atol=3e-2, rtol=3e-2), \
        f"max abs err {jnp.max(jnp.abs(out1 - ref1))}"

    # 4) gamma = 0 (the PyTorch init): the f32 residual path must reduce to x.
    out0 = jax.block_until_ready(sa(x, wq, bq, wk, bk, wv, bv, jnp.float32(0.0), tq=128))
    assert jnp.allclose(out0, x, atol=1e-6, rtol=0.0)

    print("KERNEL_OK")
</pallas_src>

<mosaic_0001>
module attributes {stable_mosaic.version = 11 : i64} {
  func.func @self_attention_kernel(%arg0: i32, %arg1: i32, %arg2: i32, %arg3: memref<1x32x128xf32, #tpu.memory_space<vmem>>, %arg4: memref<1x32x256xbf16, #tpu.memory_space<vmem>>, %arg5: memref<4x32xbf16, #tpu.memory_space<vmem>>, %arg6: memref<1x4xf32, #tpu.memory_space<vmem>>, %arg7: memref<4x32xbf16, #tpu.memory_space<vmem>>, %arg8: memref<4x1xf32, #tpu.memory_space<vmem>>, %arg9: memref<32x32xbf16, #tpu.memory_space<vmem>>, %arg10: memref<32x1xf32, #tpu.memory_space<vmem>>, %arg11: memref<1x1xf32, #tpu.memory_space<smem>>, %arg12: memref<1x32x128xf32, #tpu.memory_space<vmem>>, %arg13: memref<4x256xbf16, #tpu.memory_space<vmem>>, %arg14: memref<32x256xbf16, #tpu.memory_space<vmem>>) attributes {dimension_semantics = [#tpu.dimension_semantics<parallel>, #tpu.dimension_semantics<parallel>, #tpu.dimension_semantics<arbitrary>], iteration_bounds = array<i64: 2, 1, 2>, scalar_prefetch = 0 : i64, scratch_operands = 2 : i64, tpu.core_type = #tpu.core_type<tc>, window_params = [{transform_indices = @transform_0, window_bounds = array<i64: 1, 32, 128>}, {transform_indices = @transform_1, window_bounds = array<i64: 1, 32, 256>}, {pipeline_mode = #tpu.pipeline_mode<synchronous>, transform_indices = @transform_2, window_bounds = array<i64: 4, 32>}, {pipeline_mode = #tpu.pipeline_mode<synchronous>, transform_indices = @transform_3, window_bounds = array<i64: 1, 4>}, {pipeline_mode = #tpu.pipeline_mode<synchronous>, transform_indices = @transform_4, window_bounds = array<i64: 4, 32>}, {pipeline_mode = #tpu.pipeline_mode<synchronous>, transform_indices = @transform_5, window_bounds = array<i64: 4, 1>}, {pipeline_mode = #tpu.pipeline_mode<synchronous>, transform_indices = @transform_6, window_bounds = array<i64: 32, 32>}, {pipeline_mode = #tpu.pipeline_mode<synchronous>, transform_indices = @transform_7, window_bounds = array<i64: 32, 1>}, {transform_indices = @transform_8, window_bounds = array<i64: 1, 1>}, {transform_indices = @transform_9, window_bounds = array<i64: 1, 32, 128>}]} {
    %c0_i32 = arith.constant 0 : i32
    %0 = arith.cmpi eq, %arg2, %c0_i32 : i32
    %1 = arith.extui %0 : i1 to i32
    %c0_i32_0 = arith.constant 0 : i32
    %2 = arith.cmpi ne, %1, %c0_i32_0 : i32
    scf.if %2 {
      %c0_20 = arith.constant 0 : index
      %c0_21 = arith.constant 0 : index
      %c0_22 = arith.constant 0 : index
      %35 = vector.load %arg4[%c0_20, %c0_21, %c0_22] : memref<1x32x256xbf16, #tpu.memory_space<vmem>>, vector<1x32x256xbf16>
      %36 = vector.shape_cast %35 : vector<1x32x256xbf16> to vector<32x256xbf16>
      %c0_23 = arith.constant 0 : index
      %c0_24 = arith.constant 0 : index
      %37 = vector.load %arg7[%c0_23, %c0_24] : memref<4x32xbf16, #tpu.memory_space<vmem>>, vector<4x32xbf16>
      %cst_25 = arith.constant dense<0.000000e+00> : vector<4x256xf32>
      %38 = tpu.matmul %37, %36, %cst_25 {dimension_numbers = #tpu.dot_dimension_numbers<[1], [0], [0], [1], [0, 0, 1, 1], [], []>} : vector<4x32xbf16>, vector<32x256xbf16>, vector<4x256xf32> -> vector<4x256xf32>
      %c0_26 = arith.constant 0 : index
      %c0_27 = arith.constant 0 : index
      %39 = vector.load %arg8[%c0_26, %c0_27] : memref<4x1xf32, #tpu.memory_space<vmem>>, vector<4x1xf32>
      %40 = vector.broadcast %39 : vector<4x1xf32> to vector<4x256xf32>
      %41 = arith.addf %38, %40 : vector<4x256xf32>
      %c0_28 = arith.constant 0 : index
      %c0_29 = arith.constant 0 : index
      %42 = vector.load %arg9[%c0_28, %c0_29] : memref<32x32xbf16, #tpu.memory_space<vmem>>, vector<32x32xbf16>
      %cst_30 = arith.constant dense<0.000000e+00> : vector<32x256xf32>
      %43 = tpu.matmul %42, %36, %cst_30 {dimension_numbers = #tpu.dot_dimension_numbers<[1], [0], [0], [1], [0, 0, 1, 1], [], []>} : vector<32x32xbf16>, vector<32x256xbf16>, vector<32x256xf32> -> vector<32x256xf32>
      %c0_31 = arith.constant 0 : index
      %c0_32 = arith.constant 0 : index
      %44 = vector.load %arg10[%c0_31, %c0_32] : memref<32x1xf32, #tpu.memory_space<vmem>>, vector<32x1xf32>
      %45 = vector.broadcast %44 : vector<32x1xf32> to vector<32x256xf32>
      %46 = arith.addf %43, %45 : vector<32x256xf32>
      %47 = arith.truncf %41 : vector<4x256xf32> to vector<4x256xbf16>
      %c0_33 = arith.constant 0 : index
      %c0_34 = arith.constant 0 : index
      %48 = vector.load %arg13[%c0_33, %c0_34] : memref<4x256xbf16, #tpu.memory_space<vmem>>, vector<4x256xbf16>
      tpu.vector_store %arg13[%c0_33, %c0_34], %47 {strides = array<i32>} : memref<4x256xbf16, #tpu.memory_space<vmem>>, vector<4x256xbf16>,
      %49 = arith.truncf %46 : vector<32x256xf32> to vector<32x256xbf16>
      %c0_35 = arith.constant 0 : index
      %c0_36 = arith.constant 0 : index
      %50 = vector.load %arg14[%c0_35, %c0_36] : memref<32x256xbf16, #tpu.memory_space<vmem>>, vector<32x256xbf16>
      tpu.vector_store %arg14[%c0_35, %c0_36], %49 {strides = array<i32>} : memref<32x256xbf16, #tpu.memory_space<vmem>>, vector<32x256xbf16>,
    } else {
    }
    %c0 = arith.constant 0 : index
    %c0_1 = arith.constant 0 : index
    %c0_2 = arith.constant 0 : index
    %3 = vector.load %arg3[%c0, %c0_1, %c0_2] : memref<1x32x128xf32, #tpu.memory_space<vmem>>, vector<1x32x128xf32>
    %4 = vector.shape_cast %3 : vector<1x32x128xf32> to vector<32x128xf32>
    %5 = arith.truncf %4 : vector<32x128xf32> to vector<32x128xbf16>
    %c0_3 = arith.constant 0 : index
    %c0_4 = arith.constant 0 : index
    %6 = vector.load %arg5[%c0_3, %c0_4] : memref<4x32xbf16, #tpu.memory_space<vmem>>, vector<4x32xbf16>
    %cst = arith.constant dense<0.000000e+00> : vector<128x4xf32>
    %7 = tpu.matmul %5, %6, %cst {dimension_numbers = #tpu.dot_dimension_numbers<[0], [1], [1], [0], [0, 1, 1, 0], [], []>} : vector<32x128xbf16>, vector<4x32xbf16>, vector<128x4xf32> -> vector<128x4xf32>
    %c0_5 = arith.constant 0 : index
    %c0_6 = arith.constant 0 : index
    %8 = vector.load %arg6[%c0_5, %c0_6] : memref<1x4xf32, #tpu.memory_space<vmem>>, vector<1x4xf32>
    %9 = vector.broadcast %8 : vector<1x4xf32> to vector<128x4xf32>
    %10 = arith.addf %7, %9 : vector<128x4xf32>
    %11 = arith.truncf %10 : vector<128x4xf32> to vector<128x4xbf16>
    %c0_7 = arith.constant 0 : index
    %c0_8 = arith.constant 0 : index
    %12 = vector.load %arg13[%c0_7, %c0_8] : memref<4x256xbf16, #tpu.memory_space<vmem>>, vector<4x256xbf16>
    %cst_9 = arith.constant dense<0.000000e+00> : vector<128x256xf32>
    %13 = tpu.matmul %11, %12, %cst_9 {dimension_numbers = #tpu.dot_dimension_numbers<[1], [0], [0], [1], [0, 0, 1, 1], [], []>} : vector<128x4xbf16>, vector<4x256xbf16>, vector<128x256xf32> -> vector<128x256xf32>
    %cst_10 = arith.constant dense<0xFF800000> : vector<128xf32>
    %14 = vector.multi_reduction <maximumf>, %13, %cst_10 [1] : vector<128x256xf32> to vector<128xf32>
    %15 = vector.shape_cast %14 : vector<128xf32> to vector<128x1xf32>
    %16 = vector.broadcast %15 : vector<128x1xf32> to vector<128x256xf32>
    %17 = arith.subf %13, %16 : vector<128x256xf32>
    %18 = math.exp %17 : vector<128x256xf32>
    %cst_11 = arith.constant dense<0.000000e+00> : vector<128xf32>
    %19 = vector.multi_reduction <add>, %18, %cst_11 [1] : vector<128x256xf32> to vector<128xf32>
    %20 = vector.shape_cast %19 : vector<128xf32> to vector<128x1xf32>
    %21 = tpu.reciprocal %20 {approx = true} : vector<128x1xf32> -> vector<128x1xf32>
    %c0_12 = arith.constant 0 : index
    %c0_13 = arith.constant 0 : index
    %22 = vector.load %arg14[%c0_12, %c0_13] : memref<32x256xbf16, #tpu.memory_space<vmem>>, vector<32x256xbf16>
    %23 = arith.truncf %18 : vector<128x256xf32> to vector<128x256xbf16>
    %cst_14 = arith.constant dense<0.000000e+00> : vector<32x128xf32>
    %24 = tpu.matmul %22, %23, %cst_14 {dimension_numbers = #tpu.dot_dimension_numbers<[1], [1], [0], [0], [0, 0, 1, 0], [], []>} : vector<32x256xbf16>, vector<128x256xbf16>, vector<32x128xf32> -> vector<32x128xf32>
    %25 = tpu.transpose %21, [1, 0] : vector<128x1xf32> -> vector<1x128xf32>
    %26 = vector.broadcast %25 : vector<1x128xf32> to vector<32x128xf32>
    %27 = arith.mulf %24, %26 : vector<32x128xf32>
    %c0_15 = arith.constant 0 : index
    %c0_16 = arith.constant 0 : index
    %28 = memref.load %arg11[%c0_15, %c0_16] : memref<1x1xf32, #tpu.memory_space<smem>>
    %29 = vector.broadcast %28 : f32 to vector<32x128xf32>
    %30 = arith.mulf %29, %27 : vector<32x128xf32>
    %31 = arith.addf %30, %4 : vector<32x128xf32>
    %c0_17 = arith.constant 0 : index
    %c0_18 = arith.constant 0 : index
    %c0_19 = arith.constant 0 : index
    %32 = vector.load %arg12[%c0_17, %c0_18, %c0_19] : memref<1x32x128xf32, #tpu.memory_space<vmem>>, vector<1x32x128xf32>
    %33 = vector.shape_cast %32 : vector<1x32x128xf32> to vector<32x128xf32>
    %34 = vector.shape_cast %31 : vector<32x128xf32> to vector<1x32x128xf32>
    tpu.vector_store %arg12[%c0_17, %c0_18, %c0_19], %34 {strides = array<i32>} : memref<1x32x128xf32, #tpu.memory_space<vmem>>, vector<1x32x128xf32>,
    return
  }
  func.func @transform_0(%arg0: i32, %arg1: i32, %arg2: i32) -> (i32, i32, i32) {
    %c2_i32 = arith.constant 2 : i32
    %0 = arith.muli %arg1, %c2_i32 : i32
    %1 = arith.addi %0, %arg2 : i32
    %c0_i32 = arith.constant 0 : i32
    %c0_i32_0 = arith.constant 0 : i32
    return %arg0, %c0_i32, %1 : i32, i32, i32
  }
  func.func @transform_1(%arg0: i32, %arg1: i32, %arg2: i32) -> (i32, i32, i32) {
    %c0_i32 = arith.constant 0 : i32
    %c0_i32_0 = arith.constant 0 : i32
    %c0_i32_1 = arith.constant 0 : i32
    return %arg0, %c0_i32, %c0_i32_0 : i32, i32, i32
  }
  func.func @transform_2(%arg0: i32, %arg1: i32, %arg2: i32) -> (i32, i32) {
    %c0_i32 = arith.constant 0 : i32
    %c0_i32_0 = arith.constant 0 : i32
    %c0_i32_1 = arith.constant 0 : i32
    return %c0_i32, %c0_i32_0 : i32, i32
  }
  func.func @transform_3(%arg0: i32, %arg1: i32, %arg2: i32) -> (i32, i32) {
    %c0_i32 = arith.constant 0 : i32
    %c0_i32_0 = arith.constant 0 : i32
    %c0_i32_1 = arith.constant 0 : i32
    return %c0_i32, %c0_i32_0 : i32, i32
  }
  func.func @transform_4(%arg0: i32, %arg1: i32, %arg2: i32) -> (i32, i32) {
    %c0_i32 = arith.constant 0 : i32
    %c0_i32_0 = arith.constant 0 : i32
    %c0_i32_1 = arith.constant 0 : i32
    return %c0_i32, %c0_i32_0 : i32, i32
  }
  func.func @transform_5(%arg0: i32, %arg1: i32, %arg2: i32) -> (i32, i32) {
    %c0_i32 = arith.constant 0 : i32
    %c0_i32_0 = arith.constant 0 : i32
    %c0_i32_1 = arith.constant 0 : i32
    return %c0_i32, %c0_i32_0 : i32, i32
  }
  func.func @transform_6(%arg0: i32, %arg1: i32, %arg2: i32) -> (i32, i32) {
    %c0_i32 = arith.constant 0 : i32
    %c0_i32_0 = arith.constant 0 : i32
    %c0_i32_1 = arith.constant 0 : i32
    return %c0_i32, %c0_i32_0 : i32, i32
  }
  func.func @transform_7(%arg0: i32, %arg1: i32, %arg2: i32) -> (i32, i32) {
    %c0_i32 = arith.constant 0 : i32
    %c0_i32_0 = arith.constant 0 : i32
    %c0_i32_1 = arith.constant 0 : i32
    return %c0_i32, %c0_i32_0 : i32, i32
  }
  func.func @transform_8(%arg0: i32, %arg1: i32, %arg2: i32) -> (i32, i32) {
    %c0_i32 = arith.constant 0 : i32
    %c0_i32_0 = arith.constant 0 : i32
    %c0_i32_1 = arith.constant 0 : i32
    return %c0_i32, %c0_i32_0 : i32, i32
  }
  func.func @transform_9(%arg0: i32, %arg1: i32, %arg2: i32) -> (i32, i32, i32) {
    %c2_i32 = arith.constant 2 : i32
    %0 = arith.muli %arg1, %c2_i32 : i32
    %1 = arith.addi %0, %arg2 : i32
    %c0_i32 = arith.constant 0 : i32
    %c0_i32_0 = arith.constant 0 : i32
    return %arg0, %c0_i32, %1 : i32, i32, i32
  }
}

</mosaic_0001>

<bundles_post_ra>
// kernel: self_attention.1
= control target key start
LH: loop header
LB: loop body
LE: loop exit
PB: predicated region body
PF: predicated region fallthrough
CT: control target
= control target key end

     0   :  { %s2108_s0 = inlined_call_operand.vmem [shape: f32[2,32,256], index: 0, kind: input, shape index: {}]   ;;  %s2109_s1 = inlined_call_operand.vmem [shape: bf16[2,32,256], index: 1, kind: input, shape index: {}]   ;;  %s2110_s2 = inlined_call_operand.vmem [shape: bf16[4,32], index: 2, kind: input, shape index: {}]   ;;  %s2111_s3 = inlined_call_operand.vmem [shape: f32[1,4], index: 3, kind: input, shape index: {}]   ;;  %s2112_s4 = inlined_call_operand.vmem [shape: bf16[4,32], index: 4, kind: input, shape index: {}]   ;;  %s2113_s5 = inlined_call_operand.vmem [shape: f32[4,1], index: 5, kind: input, shape index: {}]   ;;  %s2114_s6 = inlined_call_operand.vmem [shape: bf16[32,32], index: 6, kind: input, shape index: {}]   ;;  %s2115_s7 = inlined_call_operand.vmem [shape: f32[32,1], index: 7, kind: input, shape index: {}]   ;;  %s2116_s8 = inlined_call_operand.<no memory space> [shape: f32[1,1], index: 8, kind: input, shape index: {}]   ;;  %s2117_s9 = inlined_call_operand.vmem [shape: f32[2,32,256], index: 9, kind: output, shape index: {}]  }
   0x1   :  { %14 = sst [smem:[#allocation4]] %s2116_s8 }
   0x2   :  { %s1798_s11 = smov 0   ;;  %s1800_s12 = smov 0  }
   0x3   :  { %s1802_s13 = smov 0   ;;  %s1804_s14 = smov 0  }
   0x4   :  { %s1806_s15 = smov 0   ;;  %s1808_s16 = smov 0  }
   0x5   :  { %s1810_s17 = smov 0  }
   0x6 LB: > { %s32_s8 = sadd.s32 1, %s1733_s15  ;;  %s39_s18 = sadd.s32 1, %s1737_s16  ;;  %s1741_s17 = sphi %s1810_s17, %s20_s17   ;;  %s1737_s16 = sphi %s1808_s16, %s2124_s16   ;;  %s1733_s15 = sphi %s1806_s15, %s2123_s15   ;;  %s1729_s14 = sphi %s1804_s14, %s2122_s14   ;;  %s1725_s13 = sphi %s1802_s13, %s2121_s13   ;;  %s1721_s12 = sphi %s1800_s12, %s2120_s12   ;;  %s1717_s11 = sphi %s1798_s11, %s2119_s11  }
   0x7   : > { %p33_p0 = scmp.ge.s32.totalorder %s32_s8, 2  ;;  %s1430_s19 = sadd.s32 4294967295, %s1741_s17  }
   0x8   : > { %p59_p1 = scmp.ne.s32.totalorder %s1721_s12, %s1717_s11  ;;  %p60_p2 = scmp.eq.s32.totalorder %s1741_s17, 0 }
   0x9   : > { %s2126_s8 = smov (%p33_p0, %s32_s8), 0  ;;  %s2128_s18 = smov (!%p33_p0, %s39_s18), %s1737_s16 }
   0xa   : > { %p41_p3 = scmp.ge.s32.totalorder %s2128_s18, 2  ;;  %p268_p4 = scmp.eq.s32.totalorder %s1430_s19, 3 }
   0xb   : > { %s48_s20 = ssub.s32 %s1733_s15, %s2126_s8  ;;  %p61_p5 = por %p60_p2, %p59_p1 }
   0xc   : > { %s2130_s18 = smov (%p41_p3, %s2128_s18), 0  ;;  %p1846_p6 = por %p268_p4, %p59_p1 }
   0xd   : > { %s47_s22 = ssub.s32 %s1737_s16, %s2130_s18  ;;  %s52_s24 = sadd.s32 1, %s1721_s12 }
   0xe   : > { %s49_s23 = sor.u32 %s48_s20, %s47_s22  ;;  %p1433_p8 = scmp.ge.s32.totalorder %s1741_s17, 4 }
   0xf   : > { %p50_p7 = scmp.eq.s32.totalorder %s49_s23, 0 }
  0x10   : > { %311 = sbr.rel (%p1433_p8) target bundleno = 31 (0x1f), region = 44 }
  0x11   : > { %s1854_s25 = scalar_select %p50_p7, %s1721_s12, %s52_s24  }
  0x17   : > { %314 = sbr.rel (!%p61_p5) target bundleno = 31 (0x1f), region = 48  ;;  %s316_s26 = sand.u32 (%p61_p5), 1, %s1721_s12  }
  0x18   : > { %s1435_s27 = sshll.u32 (%p61_p5), %s1737_s16, 3  ;;  %s1434_s28 = sshll.u32 (%p61_p5), %s316_s26, 5 }
  0x19   : > { %s322_s29 = sadd.s32 (%p61_p5), %s1733_s15, %s1435_s27  ;;  %s318_s22 = scalar_lea.vmem (%p61_p5), [#allocation5], %s1434_s28 }
  0x1a   : > { %s1436_s30 = sshll.u32 (%p61_p5), %s322_s29, 3 }
  0x1b   : > { %s324_s20 = scalar_lea.vmem (%p61_p5), %s2108_s0, %s1436_s30 }
  0x1c   : > { %v358_v0 = vld [vmem:[%s324_s20] sm:$0xff] (%p61_p5)  ;;  %v360_v1 = vld [vmem:[%s324_s20 + $0x10] sm:$0xff] (%p61_p5) }
  0x1d   : > { %v362_v2 = vld [vmem:[%s324_s20 + $0x20] sm:$0xff] (%p61_p5)  ;;  %359 = vst [vmem:[%s318_s22] sm:$0xff] (%p61_p5), %v358_v0  ;;  %361 = vst [vmem:[%s318_s22 + $0x8] sm:$0xff] (%p61_p5), %v360_v1  ;;  %v364_v3 = vld [vmem:[%s324_s20 + $0x30] sm:$0xff] (%p61_p5) }
  0x1e   : > { %363 = vst [vmem:[%s318_s22 + $0x10] sm:$0xff] %v362_v2  ;;  %365 = vst [vmem:[%s318_s22 + $0x18] sm:$0xff] %v364_v3 }
  0x1f PF: > { %p1437_p9 = scmp.ge.s32.totalorder %s1741_s17, 1  ;;  %p378_p10 = scmp.lt.s32.totalorder %s1741_s17, 5 }
  0x21   : > { %p379_p11 = pnand %p1437_p9, %p378_p10 }
  0x22   : > { %s385_s23 = sand.u32 (!%p379_p11), 1, %s1717_s11   ;;  %p426_p12 = scmp.lt.s32.totalorder (!%p379_p11), %s1729_s14, 1 }
  0x23   : > { %382 = sbr.rel (%p379_p11) target bundleno = 1289 (0x509), region = 90  ;;  %s1438_s24 = sshll.u32 (!%p379_p11), %s385_s23, 5 }
  0x24   : > { %s1871_s10 = scalar_lea.vmem (!%p379_p11), [#allocation5], %s1438_s24  ;;  %s1873_s19 = scalar_lea.vmem (!%p379_p11), [#allocation6], %s1438_s24 }
  0x25   : > { %p1442_p13 = scmp.ne.s32.totalorder (!%p379_p11), %s1725_s13, 0 }
  0x2a   : > { %s427_s26 = scalar_select %p426_p12, %s1729_s14, 1 }
  0x2b   : > { %437 = sbr.rel (%p1442_p13) target bundleno = 283 (0x11b), region = 98  ;;  %v1743_v6 = vmov (!%p1442_p13), 0   ;;  %v443_v9 = vld [vmem:[%s2113_s5] sm:$0xf] (!%p1442_p13)  ;;  %v519_v10 = vld [vmem:[%s2115_s7 + $0x8] sm:$0xff] (!%p1442_p13)  ;;  %vm469_vm0 = vcmask (!%p1442_p13), 261120  }
  0x2c   : > { %s1478_s27 = sshll.u32 %s427_s26, 5  ;;  %590 = vmatprep.mubr.bf16.mxu1 (!%p1442_p13), %v1743_v6  ;;  %505 = vmatprep.mubr.bf16.mxu0 (!%p1442_p13), %v1743_v6  ;;  %v1589_v11 = vld [vmem:[%s2114_s6] sm:$0xff] (!%p1442_p13)   ;;  %v520_v14 = vld [vmem:[%s2115_s7 + $0x10] sm:$0xff] (!%p1442_p13)  ;;  %v521_v15 = vld [vmem:[%s2115_s7 + $0x18] sm:$0xff] (!%p1442_p13) }
  0x2d   : > { %s430_s30 = scalar_lea.vmem %s2109_s1, %s1478_s27  ;;  %1581 = vset.pattern.permute.xlu0 (!%p1442_p13), %v1743_v6  ;;  %1582 = vset.pattern.permute.xlu1 (!%p1442_p13), %v1743_v6  ;;  %v442_v12 = vld [vmem:[%s2112_s4] sm:$0x3] (!%p1442_p13)  ;;  %v1590_v16 = vld [vmem:[%s2114_s6 + $0x8] sm:$0xff] (!%p1442_p13)  }
  0x2e   : > { %v1583_v4 = vld [vmem:[%s430_s30 + $0x4] ss:$8 sps:$4 sm:$0xff] (!%p1442_p13)   ;;  %v1585_v5 = vld [vmem:[%s430_s30] ss:$8 sps:$4 sm:$0xff] (!%p1442_p13)   ;;  %v1586_v7 = vld [vmem:[%s430_s30 + $0x14] ss:$8 sps:$4 sm:$0xff] (!%p1442_p13)   ;;  %446 = vperm.xlu0 (!%p1442_p13), %1581, %v443_v9   ;;  %529 = vperm.xlu1 (!%p1442_p13), %1582, %v519_v10  }
  0x2f   : > { %558 = vmatprep.subr.bf16.mxu1 (!%p1442_p13), %v1583_v4  ;;  %473 = vmatprep.subr.bf16.mxu0 (!%p1442_p13), %v1583_v4  ;;  %v1588_v8 = vld [vmem:[%s430_s30 + $0x10] ss:$8 sps:$4 sm:$0xff] (!%p1442_p13)   ;;  %v518_v13 = vld [vmem:[%s2115_s7] sm:$0xff] (!%p1442_p13) }
  0x30   : > { %559 = vmatpush1.bf16.msra.mxu1 (!%p1442_p13), %v1585_v5  ;;  %474 = vmatpush1.bf16.msra.mxu0 (!%p1442_p13), %v1585_v5 }
  0x31   : > { %560 = vmatprep.subr.bf16.mxu1 (!%p1442_p13), %v1586_v7  ;;  %475 = vmatprep.subr.bf16.mxu0 (!%p1442_p13), %v1586_v7 }
  0x32   : > { %524 = vperm.xlu0 %1581, %v518_v13   ;;  %534 = vperm.xlu1 %1582, %v520_v14  }
  0x34   : > { %561 = vmatpush1.bf16.msra.mxu1 %v1588_v8  ;;  %476 = vmatpush1.bf16.msra.mxu0 %v1588_v8 }
  0x36   : > { %539 = vperm.xlu0 %1581, %v521_v15  }
  0x37   : > { %1450 = vmatmul.mubr.msk.bf16.vlgmr.msra.gmra.mrb[0].mxu1 %vm469_vm0, %v1589_v11  ;;  %1447 = vmatmul.mubr.msk.bf16.vlgmr.msra.gmra.mrb[0].mxu0 %vm469_vm0, %v442_v12 }
  0x38   : > { %600 = vmatprep.mubr.bf16.mxu1 %v1743_v6 }
  0x3f   : > { %1451 = vmatmul.mubr.msk.bf16.gmra.mrb[4].mxu1 %vm469_vm0, %v1590_v16 }
  0xad   : > { %v447_v17 = vpop.permute.xlu0 %446  ;;  %v530_v19 = vpop.permute.xlu1 %529 }
  0xb1   : > { %v525_v18 = vpop.permute.xlu0 %524  ;;  %v535_v37 = vpop.permute.xlu1 %534 }
  0xb5   : > { %v540_v40 = vpop.permute.xlu0 %539 }
 0x10a   : > { %v592_v20 = vpop.f32.mrb[0].mxu1  ;;  %v507_v21 = vpop.f32.mrb[0].mxu0 }
 0x10b   : > { %v594_v22 = vpop.f32.mrb[1].mxu1  ;;  %v508_v23 = vadd.f32 %v507_v21, %v447_v17  ;;  %v509_v24 = vpop.f32.mrb[1].mxu0  ;;  %v593_v28 = vadd.f32 %v592_v20, %v525_v18 }
 0x10c   : > { %v596_v25 = vpop.f32.mrb[2].mxu1  ;;  %v510_v26 = vadd.f32 %v509_v24, %v447_v17  ;;  %v511_v27 = vpop.f32.mrb[2].mxu0  ;;  %v595_v32 = vadd.f32 %v594_v22, %v525_v18 }
 0x10d   : > { %v597_v29 = vadd.f32 %v596_v25, %v530_v19  ;;  %v598_v30 = vpop.f32.mrb[3].mxu1  ;;  %v512_v31 = vpop.f32.mrb[3].mxu0 }
 0x10e   : > { %v1452_v33 = vpack.c.bf16 %v510_v26, %v508_v23  ;;  %v599_v34 = vadd.f32 %v598_v30, %v530_v19 }
 0x10f   : > { %v625_v35 = vpack.c.bf16 %v597_v29, %v593_v28 }
 0x110   : > { %1453 = vst.sshfl [vmem:[#allocation2] sm:$0x33 pattern:$0x76325410] %v1452_v33  ;;  %v626_v36 = vpack.c.bf16 %v599_v34, %v595_v32 }
 0x111   : > { %629 = vst [vmem:[#allocation3] sm:$0xff] %v625_v35 }
 0x112   : > { %630 = vst [vmem:[#allocation3 + $0x8] sm:$0xff] %v626_v36  ;;  %v602_v38 = vpop.f32.mrb[4].mxu1 }
 0x113   : > { %v604_v39 = vpop.f32.mrb[5].mxu1  ;;  %v603_v42 = vadd.f32 %v602_v38, %v535_v37 }
 0x114   : > { %v606_v41 = vpop.f32.mrb[6].mxu1  ;;  %v605_v45 = vadd.f32 %v604_v39, %v535_v37 }
 0x115   : > { %v607_v43 = vadd.f32 %v606_v41, %v540_v40  ;;  %v608_v44 = vpop.f32.mrb[7].mxu1 }
 0x116   : > { %v609_v46 = vadd.f32 %v608_v44, %v540_v40 }
 0x117   : > { %v627_v47 = vpack.c.bf16 %v607_v43, %v603_v42 }
 0x118   : > { %v628_v48 = vpack.c.bf16 %v609_v46, %v605_v45 }
 0x119   : > { %631 = vst [vmem:[#allocation3 + $0x10] sm:$0xff] %v627_v47 }
 0x11a   : > { %632 = vst [vmem:[#allocation3 + $0x18] sm:$0xff] %v628_v48 }
 0x11b PF: > { %v1901_v49 = vld [vmem:[%s1871_s10] sm:$0xff]  ;;  %v1904_v50 = vld [vmem:[%s1871_s10 + $0x8] sm:$0xff]  ;;  %v1907_v51 = vld [vmem:[%s1871_s10 + $0x10] sm:$0xff]  ;;  %vm663_vm1 = vcmask 261120   ;;  %vm831_vm2 = vcmask 1041408   ;;  %v1744_v4 = vmov 0  }
 0x11c   : > { %v637_v52 = vpack.c.bf16 %v1904_v50, %v1901_v49  ;;  %v1912_v53 = vld [vmem:[%s1871_s10 + $0x18] sm:$0xff]  ;;  %870 = vmatprep.mubr.bf16.mxu1 %v1744_v4  ;;  %vm806_vm3 = vcmask 31744   ;;  %s1268_s30 = sld [smem:[#allocation4]]  ;;  %s1474_s11 = sshll.u32 (%p1846_p6), %s1729_s14, 3 }
 0x11d   : > { %v639_v54 = vld [vmem:[%s2110_s2] sm:$0x3]  ;;  %v638_v56 = vpack.c.bf16 %v1912_v53, %v1907_v51  ;;  %s1292_s20 = sadd.s32 (%p1846_p6), %s1725_s13, %s1474_s11 }
 0x11e   : > { %1522 = vmatprep.subr.msk.bf16.mxu0 %vm663_vm1, %v639_v54  ;;  %v689_v55 = vsel %vm663_vm1, %v639_v54, 0  ;;  %647 = vxpose.xlu0.c.b16.start [1/2] (short) %v637_v52, 128  ;;  %v1463_v1 = vld.sshfl [vmem:[#allocation2] sm:$0x33 pattern:$0x76325410]  ;;  %s1475_s22 = sshll.u32 (%p1846_p6), %s1292_s20, 3 }
 0x11f   : > { %1489 = vmatpush3.bf16.xpose.msra.mxu0 %v689_v55  ;;  %v805_v2 = vcombine.high %v1463_v1, %v1463_v1  ;;  %v833_v3 = vsel %vm831_vm2, %v1463_v1, 0  ;;  %v1454_v6 = vld [vmem:[%s2111_s3] ss:$0 sm:$0xff]  ;;  %s1294_s26 = scalar_lea.vmem (%p1846_p6), %s2117_s9, %s1475_s22 }
 0x121   : > { %1464 = vmatprep.subr.msk.bf16.mxu1 %vm831_vm2, %v805_v2 }
 0x122   : > { %648 = vxpose.xlu0.c.b16.end [2/2] (short) %v638_v56, 128  ;;  %839 = vmatpush1.bf16.msra.mxu1 %v833_v3 }
 0x184   : > { %v655_v57 = vpop.trf.xlu0 }
 0x185   : > { %1490 = vmatprep.mubr.msk.bf16.mxu0 %vm663_vm1, %v655_v57 }
 0x188   : > { %v656_v58 = vpop.trf.xlu0 }
 0x189   : > { %1491 = vmatmul.mubr.msk.bf16.vlgmr.msra.gmra.mrb[0].mxu0 %vm663_vm1, %v656_v58 }
 0x18c   : > { %v657_v59 = vpop.trf.xlu0 }
 0x18d   : > { %1494 = vmatprep.mubr.msk.bf16.mxu0 %vm663_vm1, %v657_v59 }
 0x190   : > { %v658_v60 = vpop.trf.xlu0 }
 0x191   : > { %1495 = vmatmul.mubr.msk.bf16.gmra.mrb[4].mxu0 %vm663_vm1, %v658_v60 }
 0x194   : > { %v659_v61 = vpop.trf.xlu0 }
 0x195   : > { %1498 = vmatprep.mubr.msk.bf16.mxu0 %vm663_vm1, %v659_v61 }
 0x198   : > { %v660_v62 = vpop.trf.xlu0 }
 0x199   : > { %1499 = vmatmul.mubr.msk.bf16.gmra.mrb[8].mxu0 %vm663_vm1, %v660_v62 }
 0x19c   : > { %v661_v63 = vpop.trf.xlu0 }
 0x19d   : > { %1502 = vmatprep.mubr.msk.bf16.mxu0 %vm663_vm1, %v661_v63 }
 0x1a0   : > { %v662_v0 = vpop.trf.xlu0 }
 0x1a1   : > { %1503 = vmatmul.mubr.msk.bf16.gmra.mrb[12].mxu0 %vm663_vm1, %v662_v0 }
 0x25c   : > { %v1492_v5 = vpop.f32.mrb[0].mxu0 }
 0x25d   : > { %v725_v7 = vpop.f32.mrb[1].mxu0  ;;  %v734_v9 = vadd.f32 %v1492_v5, %v1454_v6 }
 0x25e   : > { %v1493_v8 = vpop.f32.mrb[2].mxu0  ;;  %v726_v12 = vadd.f32 %v1454_v6, %v725_v7 }
 0x25f   : > { %v737_v10 = vadd.f32 %v1493_v8, %v1454_v6  ;;  %v728_v11 = vpop.f32.mrb[3].mxu0 }
 0x260   : > { %v729_v13 = vadd.f32 %v1454_v6, %v728_v11 }
 0x261   : > { %v789_v14 = vpack.c.bf16 %v737_v10, %v734_v9 }
 0x262   : > { %v788_v15 = vpack.c.bf16 %v729_v13, %v726_v12 }
 0x264   : > { %1465 = vmatmul.mubr.msk.bf16.vlgmr.msra.gmra.mrb[0].mxu1 %vm806_vm3, %v788_v15  ;;  %v1496_v16 = vpop.f32.mrb[4].mxu0 }
 0x265   : > { %v750_v17 = vadd.f32 %v1496_v16, %v1454_v6  ;;  %v741_v18 = vpop.f32.mrb[5].mxu0  ;;  %880 = vmatprep.mubr.bf16.mxu1 %v1744_v4 }
 0x266   : > { %v742_v19 = vadd.f32 %v1454_v6, %v741_v18  ;;  %v1497_v20 = vpop.f32.mrb[6].mxu0 }
 0x267   : > { %v753_v21 = vadd.f32 %v1497_v20, %v1454_v6  ;;  %v744_v22 = vpop.f32.mrb[7].mxu0 }
 0x268   : > { %v745_v23 = vadd.f32 %v1454_v6, %v744_v22 }
 0x269   : > { %v791_v24 = vpack.c.bf16 %v753_v21, %v750_v17 }
 0x26a   : > { %v790_v25 = vpack.c.bf16 %v745_v23, %v742_v19 }
 0x26c   : > { %1466 = vmatmul.mubr.msk.bf16.gmra.mrb[4].mxu1 %vm806_vm3, %v789_v14  ;;  %v1500_v26 = vpop.f32.mrb[8].mxu0 }
 0x26d   : > { %890 = vmatprep.mubr.bf16.mxu1 %v1744_v4  ;;  %v766_v27 = vadd.f32 %v1500_v26, %v1454_v6  ;;  %v757_v28 = vpop.f32.mrb[9].mxu0 }
 0x26e   : > { %v758_v29 = vadd.f32 %v1454_v6, %v757_v28  ;;  %v1501_v30 = vpop.f32.mrb[10].mxu0 }
 0x26f   : > { %v769_v31 = vadd.f32 %v1501_v30, %v1454_v6  ;;  %v760_v32 = vpop.f32.mrb[11].mxu0 }
 0x270   : > { %v761_v33 = vadd.f32 %v1454_v6, %v760_v32 }
 0x271   : > { %v793_v34 = vpack.c.bf16 %v769_v31, %v766_v27 }
 0x272   : > { %v792_v35 = vpack.c.bf16 %v761_v33, %v758_v29 }
 0x274   : > { %1467 = vmatmul.mubr.msk.bf16.gmra.mrb[8].mxu1 %vm806_vm3, %v790_v25  ;;  %v1504_v36 = vpop.f32.mrb[12].mxu0 }
 0x275   : > { %900 = vmatprep.mubr.bf16.mxu1 %v1744_v4  ;;  %v782_v37 = vadd.f32 %v1504_v36, %v1454_v6  ;;  %v773_v38 = vpop.f32.mrb[13].mxu0 }
 0x276   : > { %v774_v39 = vadd.f32 %v1454_v6, %v773_v38  ;;  %v1505_v40 = vpop.f32.mrb[14].mxu0 }
 0x277   : > { %v785_v41 = vadd.f32 %v1505_v40, %v1454_v6  ;;  %v776_v42 = vpop.f32.mrb[15].mxu0 }
 0x278   : > { %v777_v43 = vadd.f32 %v1454_v6, %v776_v42 }
 0x279   : > { %v795_v44 = vpack.c.bf16 %v785_v41, %v782_v37 }
 0x27a   : > { %v794_v45 = vpack.c.bf16 %v777_v43, %v774_v39 }
 0x27c   : > { %1468 = vmatmul.mubr.msk.bf16.gmra.mrb[12].mxu1 %vm806_vm3, %v791_v24 }
 0x27d   : > { %910 = vmatprep.mubr.bf16.mxu1 %v1744_v4 }
 0x284   : > { %1469 = vmatmul.mubr.msk.bf16.gmra.mrb[16].mxu1 %vm806_vm3, %v792_v35  ;;  %v1162_v35 = vld [vmem:[#allocation3 + $0x18] sm:$0xff] }
 0x285   : > { %920 = vmatprep.mubr.bf16.mxu1 %v1744_v4 }
 0x28c   : > { %1470 = vmatmul.mubr.msk.bf16.gmra.mrb[20].mxu1 %vm806_vm3, %v793_v34  ;;  %v1160_v34 = vld [vmem:[#allocation3 + $0x8] sm:$0xff] }
 0x28d   : > { %930 = vmatprep.mubr.bf16.mxu1 %v1744_v4  ;;  %1211 = vmatprep.mubr.bf16.mxu0 %v1160_v34 }
 0x294   : > { %1471 = vmatmul.mubr.msk.bf16.gmra.mrb[24].mxu1 %vm806_vm3, %v794_v45 }
 0x295   : > { %940 = vmatprep.mubr.bf16.mxu1 %v1744_v4 }
 0x29c   : > { %1472 = vmatmul.mubr.msk.bf16.gmra.mrb[28].mxu1 %vm806_vm3, %v795_v44 }
 0x29d   : > { %1219 = vmatprep.mubr.bf16.mxu1 %v1162_v35 }
 0x337   : > { %v1940_v46 = vpop.f32.mrb[0].mxu1 }
 0x338   : > { %v1942_v47 = vpop.f32.mrb[1].mxu1 }
 0x339   : > { %v1944_v48 = vpop.f32.mrb[2].mxu1  ;;  %v951_v52 = vmax.f32 %v1940_v46, %v1942_v47 }
 0x33a   : > { %v1948_v54 = vpop.f32.mrb[3].mxu1 }
 0x33b   : > { %952 = vmax.xlane.f32.xlu1 %v951_v52  ;;  %v954_v55 = vmax.f32 %v1944_v48, %v1948_v54 }
 0x33f   : > { %955 = vmax.xlane.f32.xlu1 %v954_v55  ;;  %v1952_v56 = vpop.f32.mrb[4].mxu1 }
 0x340   : > { %v1954_v57 = vpop.f32.mrb[5].mxu1 }
 0x341   : > { %v1956_v58 = vpop.f32.mrb[6].mxu1  ;;  %v957_v59 = vmax.f32 %v1952_v56, %v1954_v57 }
 0x342   : > { %v1960_v60 = vpop.f32.mrb[7].mxu1 }
 0x343   : > { %958 = vmax.xlane.f32.xlu0 %v957_v59  ;;  %v960_v61 = vmax.f32 %v1956_v58, %v1960_v60 }
 0x345   : > { %961 = vmax.xlane.f32.xlu1 %v960_v61 }
 0x347   : > { %v1964_v62 = vpop.f32.mrb[8].mxu1 }
 0x348   : > { %v1966_v63 = vpop.f32.mrb[9].mxu1 }
 0x349   : > { %v1968_v0 = vpop.f32.mrb[10].mxu1  ;;  %v963_v1 = vmax.f32 %v1964_v62, %v1966_v63 }
 0x34a   : > { %v1972_v2 = vpop.f32.mrb[11].mxu1 }
 0x34b   : > { %964 = vmax.xlane.f32.xlu1 %v963_v1  ;;  %v966_v3 = vmax.f32 %v1968_v0, %v1972_v2 }
 0x34f   : > { %967 = vmax.xlane.f32.xlu1 %v966_v3  ;;  %v1976_v4 = vpop.f32.mrb[12].mxu1 }
 0x350   : > { %v1978_v5 = vpop.f32.mrb[13].mxu1 }
 0x351   : > { %v1980_v6 = vpop.f32.mrb[14].mxu1  ;;  %v969_v7 = vmax.f32 %v1976_v4, %v1978_v5 }
 0x352   : > { %v1984_v8 = vpop.f32.mrb[15].mxu1 }
 0x353   : > { %970 = vmax.xlane.f32.xlu1 %v969_v7  ;;  %v972_v9 = vmax.f32 %v1980_v6, %v1984_v8 }
 0x357   : > { %973 = vmax.xlane.f32.xlu1 %v972_v9  ;;  %v1988_v10 = vpop.f32.mrb[16].mxu1 }
 0x358   : > { %v1990_v11 = vpop.f32.mrb[17].mxu1 }
 0x359   : > { %v1992_v12 = vpop.f32.mrb[18].mxu1  ;;  %v975_v13 = vmax.f32 %v1988_v10, %v1990_v11 }
 0x35a   : > { %v1996_v14 = vpop.f32.mrb[19].mxu1 }
 0x35b   : > { %976 = vmax.xlane.f32.xlu1 %v975_v13  ;;  %v978_v15 = vmax.f32 %v1992_v12, %v1996_v14 }
 0x35f   : > { %979 = vmax.xlane.f32.xlu1 %v978_v15  ;;  %v2000_v16 = vpop.f32.mrb[20].mxu1 }
 0x360   : > { %v2002_v17 = vpop.f32.mrb[21].mxu1 }
 0x361   : > { %v2004_v18 = vpop.f32.mrb[22].mxu1  ;;  %v981_v19 = vmax.f32 %v2000_v16, %v2002_v17 }
 0x362   : > { %v2008_v20 = vpop.f32.mrb[23].mxu1 }
 0x363   : > { %982 = vmax.xlane.f32.xlu1 %v981_v19  ;;  %v984_v21 = vmax.f32 %v2004_v18, %v2008_v20 }
 0x367   : > { %985 = vmax.xlane.f32.xlu1 %v984_v21  ;;  %v2012_v22 = vpop.f32.mrb[24].mxu1 }
 0x368   : > { %v2014_v23 = vpop.f32.mrb[25].mxu1 }
 0x369   : > { %v2016_v24 = vpop.f32.mrb[26].mxu1  ;;  %v987_v25 = vmax.f32 %v2012_v22, %v2014_v23 }
 0x36a   : > { %v2020_v26 = vpop.f32.mrb[27].mxu1 }
 0x36b   : > { %988 = vmax.xlane.f32.xlu1 %v987_v25  ;;  %v990_v27 = vmax.f32 %v2016_v24, %v2020_v26 }
 0x36d   : > { %991 = vmax.xlane.f32.xlu0 %v990_v27 }
 0x36f   : > { %v2024_v28 = vpop.f32.mrb[28].mxu1 }
 0x370   : > { %v2026_v29 = vpop.f32.mrb[29].mxu1 }
 0x371   : > { %v2028_v30 = vpop.f32.mrb[30].mxu1  ;;  %v993_v31 = vmax.f32 %v2024_v28, %v2026_v29 }
 0x372   : > { %v2032_v32 = vpop.f32.mrb[31].mxu1 }
 0x373   : > { %994 = vmax.xlane.f32.xlu1 %v993_v31  ;;  %v996_v33 = vmax.f32 %v2028_v30, %v2032_v32 }
 0x375   : > { %997 = vmax.xlane.f32.xlu0 %v996_v33 }
 0x3c8   : > { %v953_v36 = vpop.xlane.xlu1 %952 }
 0x3c9   : > { %v999_v37 = vsub.f32 %v1940_v46, %v953_v36  ;;  %v1000_v38 = vsub.f32 %v1942_v47, %v953_v36 }
 0x3cb   : > { %v1031_v39 = vmul.f32 1.442695, %v999_v37  ;;  %v1033_v40 = vmul.f32 1.442695, %v1000_v38 }
 0x3cc   : > { %v956_v41 = vpop.xlane.xlu1 %955 }
 0x3cd   : > { %1591 = vpow2.f32 %v1031_v39  ;;  %v1001_v42 = vsub.f32 %v1944_v48, %v956_v41  ;;  %v1002_v43 = vsub.f32 %v1948_v54, %v956_v41 }
 0x3ce   : > { %1593 = vpow2.f32 %v1033_v40 }
 0x3cf   : > { %v1035_v44 = vmul.f32 1.442695, %v1001_v42  ;;  %v1037_v45 = vmul.f32 1.442695, %v1002_v43 }
 0x3d0   : > { %v959_v52 = vpop.xlane.xlu0 %958 }
 0x3d1   : > { %1595 = vpow2.f32 %v1035_v44  ;;  %v1003_v55 = vsub.f32 %v1952_v56, %v959_v52  ;;  %v1004_v59 = vsub.f32 %v1954_v57, %v959_v52 }
 0x3d2   : > { %1597 = vpow2.f32 %v1037_v45  ;;  %v962_v46 = vpop.xlane.xlu1 %961 }
 0x3d3   : > { %v1039_v47 = vmul.f32 1.442695, %v1003_v55  ;;  %v1041_v61 = vmul.f32 1.442695, %v1004_v59  ;;  %v1005_v1 = vsub.f32 %v1956_v58, %v962_v46  ;;  %v1006_v3 = vsub.f32 %v1960_v60, %v962_v46 }
 0x3d5   : > { %1599 = vpow2.f32 %v1039_v47  ;;  %v1043_v48 = vmul.f32 1.442695, %v1005_v1  ;;  %v1045_v54 = vmul.f32 1.442695, %v1006_v3 }
 0x3d6   : > { %1601 = vpow2.f32 %v1041_v61 }
 0x3d7   : > { %v1592_v7 = vpop.eup %1591  ;;  %1603 = vpow2.f32 %v1043_v48 }
 0x3d8   : > { %v1594_v9 = vpop.eup %1593  ;;  %1605 = vpow2.f32 %v1045_v54  ;;  %v965_v13 = vpop.xlane.xlu1 %964 }
 0x3d9   : > { %v1007_v56 = vsub.f32 %v1964_v62, %v965_v13  ;;  %v1008_v57 = vsub.f32 %v1966_v63, %v965_v13  ;;  %v1095_v15 = vadd.f32 %v1594_v9, %v1592_v7 }
 0x3db   : > { %v1596_v19 = vpop.eup %1595  ;;  %v1047_v21 = vmul.f32 1.442695, %v1007_v56  ;;  %v1049_v25 = vmul.f32 1.442695, %v1008_v57  ;;  %1096 = vadd.xlane.f32.xlu1 %v1095_v15 }
 0x3dc   : > { %v1598_v58 = vpop.eup %1597  ;;  %v968_v60 = vpop.xlane.xlu1 %967  ;;  %v1163_v27 = vpack.c.bf16 %v1596_v19, %v1592_v7 }
 0x3dd   : > { %1607 = vpow2.f32 %v1047_v21  ;;  %v1009_v31 = vsub.f32 %v1968_v0, %v968_v60  ;;  %v1010_v33 = vsub.f32 %v1972_v2, %v968_v60  ;;  %v1164_v34 = vpack.c.bf16 %v1598_v58, %v1594_v9 }
 0x3de   : > { %1609 = vpow2.f32 %v1049_v25  ;;  %v1098_v35 = vadd.f32 %v1598_v58, %v1596_v19 }
 0x3df   : > { %v1600_v36 = vpop.eup %1599  ;;  %v1051_v62 = vmul.f32 1.442695, %v1009_v31  ;;  %v1053_v37 = vmul.f32 1.442695, %v1010_v33  ;;  %1179 = vmatprep.subr.bf16.mxu0 %v1164_v34  ;;  %1506 = vmatprep.subr.bf16.mxu1 %v1164_v34 }
 0x3e0   : > { %v1602_v63 = vpop.eup %1601  ;;  %1099 = vadd.xlane.f32.xlu0 %v1098_v35  ;;  %1180 = vmatpush1.bf16.xpose.msra.mxu0 %v1163_v27  ;;  %v971_v38 = vpop.xlane.xlu1 %970 }
 0x3e1   : > { %v1604_v39 = vpop.eup %1603  ;;  %1611 = vpow2.f32 %v1051_v62  ;;  %1514 = vmatpush1.bf16.xpose.msra.mxu1 %v1163_v27  ;;  %v1011_v40 = vsub.f32 %v1976_v4, %v971_v38  ;;  %v1012_v0 = vsub.f32 %v1978_v5, %v971_v38  ;;  %v1101_v2 = vadd.f32 %v1602_v63, %v1600_v36 }
 0x3e2   : > { %v1606_v41 = vpop.eup %1605  ;;  %1613 = vpow2.f32 %v1053_v37  ;;  %v1165_v42 = vpack.c.bf16 %v1604_v39, %v1600_v36 }
 0x3e3   : > { %v1055_v43 = vmul.f32 1.442695, %v1011_v40  ;;  %v1057_v44 = vmul.f32 1.442695, %v1012_v0  ;;  %1102 = vadd.xlane.f32.xlu1 %v1101_v2  ;;  %v1104_v45 = vadd.f32 %v1606_v41, %v1604_v39  ;;  %v1166_v52 = vpack.c.bf16 %v1606_v41, %v1602_v63 }
 0x3e4   : > { %v974_v55 = vpop.xlane.xlu1 %973 }
 0x3e5   : > { %1615 = vpow2.f32 %v1055_v43  ;;  %v1013_v59 = vsub.f32 %v1980_v6, %v974_v55  ;;  %v1014_v46 = vsub.f32 %v1984_v8, %v974_v55  ;;  %1105 = vadd.xlane.f32.xlu0 %v1104_v45  ;;  %1181 = vmatprep.subr.bf16.mxu0 %v1166_v52 }
 0x3e6   : > { %1617 = vpow2.f32 %v1057_v44  ;;  %1507 = vmatprep.subr.bf16.mxu1 %v1166_v52 }
 0x3e7   : > { %v1608_v4 = vpop.eup %1607  ;;  %v1059_v5 = vmul.f32 1.442695, %v1013_v59  ;;  %v1061_v47 = vmul.f32 1.442695, %v1014_v46 }
 0x3e8   : > { %v1610_v61 = vpop.eup %1609  ;;  %1182 = vmatpush1.bf16.xpose.msra.mxu0 %v1165_v42  ;;  %v977_v1 = vpop.xlane.xlu1 %976 }
 0x3e9   : > { %1619 = vpow2.f32 %v1059_v5  ;;  %1515 = vmatpush1.bf16.xpose.msra.mxu1 %v1165_v42  ;;  %v1015_v3 = vsub.f32 %v1988_v10, %v977_v1  ;;  %v1016_v48 = vsub.f32 %v1990_v11, %v977_v1  ;;  %v1107_v54 = vadd.f32 %v1610_v61, %v1608_v4 }
 0x3ea   : > { %1621 = vpow2.f32 %v1061_v47 }
 0x3eb   : > { %v1612_v6 = vpop.eup %1611  ;;  %v1063_v8 = vmul.f32 1.442695, %v1015_v3  ;;  %v1065_v7 = vmul.f32 1.442695, %v1016_v48  ;;  %1108 = vadd.xlane.f32.xlu1 %v1107_v54 }
 0x3ec   : > { %v1614_v9 = vpop.eup %1613  ;;  %v980_v13 = vpop.xlane.xlu1 %979  ;;  %v1167_v56 = vpack.c.bf16 %v1612_v6, %v1608_v4 }
 0x3ed   : > { %1623 = vpow2.f32 %v1063_v8  ;;  %v1017_v57 = vsub.f32 %v1992_v12, %v980_v13  ;;  %v1018_v15 = vsub.f32 %v1996_v14, %v980_v13  ;;  %v1110_v19 = vadd.f32 %v1614_v9, %v1612_v6 }
 0x3ee   : > { %1625 = vpow2.f32 %v1065_v7  ;;  %v1168_v21 = vpack.c.bf16 %v1614_v9, %v1610_v61 }
 0x3ef   : > { %v1616_v10 = vpop.eup %1615  ;;  %v1067_v25 = vmul.f32 1.442695, %v1017_v57  ;;  %v1069_v11 = vmul.f32 1.442695, %v1018_v15  ;;  %1111 = vadd.xlane.f32.xlu0 %v1110_v19 }
 0x3f0   : > { %v1618_v58 = vpop.eup %1617  ;;  %1183 = vmatprep.subr.bf16.mxu0 %v1168_v21  ;;  %1508 = vmatprep.subr.bf16.mxu1 %v1168_v21  ;;  %v983_v60 = vpop.xlane.xlu1 %982 }
 0x3f1   : > { %1627 = vpow2.f32 %v1067_v25  ;;  %1184 = vmatpush1.bf16.xpose.msra.mxu0 %v1167_v56  ;;  %1516 = vmatpush1.bf16.xpose.msra.mxu1 %v1167_v56  ;;  %v1019_v27 = vsub.f32 %v2000_v16, %v983_v60  ;;  %v1020_v12 = vsub.f32 %v2002_v17, %v983_v60  ;;  %v1113_v31 = vadd.f32 %v1618_v58, %v1616_v10 }
 0x3f2   : > { %1629 = vpow2.f32 %v1069_v11 }
 0x3f3   : > { %v1620_v14 = vpop.eup %1619  ;;  %v1071_v33 = vmul.f32 1.442695, %v1019_v27  ;;  %v1073_v34 = vmul.f32 1.442695, %v1020_v12  ;;  %1114 = vadd.xlane.f32.xlu1 %v1113_v31 }
 0x3f4   : > { %v1622_v35 = vpop.eup %1621  ;;  %v986_v36 = vpop.xlane.xlu1 %985  ;;  %v1169_v62 = vpack.c.bf16 %v1620_v14, %v1616_v10 }
 0x3f5   : > { %1631 = vpow2.f32 %v1071_v33  ;;  %v1021_v37 = vsub.f32 %v2004_v18, %v986_v36  ;;  %v1022_v63 = vsub.f32 %v2008_v20, %v986_v36  ;;  %v1116_v38 = vadd.f32 %v1622_v35, %v1620_v14  ;;  %v1159_v36 = vld [vmem:[#allocation3] sm:$0xff] }
 0x3f6   : > { %1633 = vpow2.f32 %v1073_v34  ;;  %v1170_v39 = vpack.c.bf16 %v1622_v35, %v1618_v58 }
 0x3f7   : > { %v1624_v16 = vpop.eup %1623  ;;  %v1075_v40 = vmul.f32 1.442695, %v1021_v37  ;;  %v1077_v17 = vmul.f32 1.442695, %v1022_v63  ;;  %1117 = vadd.xlane.f32.xlu0 %v1116_v38 }
 0x3f8   : > { %v1626_v0 = vpop.eup %1625  ;;  %1185 = vmatprep.subr.bf16.mxu0 %v1170_v39  ;;  %1509 = vmatprep.subr.bf16.mxu1 %v1170_v39  ;;  %v989_v2 = vpop.xlane.xlu1 %988 }
 0x3f9   : > { %1635 = vpow2.f32 %v1075_v40  ;;  %1186 = vmatpush1.bf16.xpose.msra.mxu0 %v1169_v62  ;;  %1517 = vmatpush1.bf16.xpose.msra.mxu1 %v1169_v62  ;;  %v1023_v41 = vsub.f32 %v2012_v22, %v989_v2  ;;  %v1024_v18 = vsub.f32 %v2014_v23, %v989_v2  ;;  %v1119_v42 = vadd.f32 %v1626_v0, %v1624_v16  ;;  %v1161_v62 = vld [vmem:[#allocation3 + $0x10] sm:$0xff] }
 0x3fa   : > { %1637 = vpow2.f32 %v1077_v17  ;;  %v992_v20 = vpop.xlane.xlu0 %991 }
 0x3fb   : > { %v1628_v43 = vpop.eup %1627  ;;  %v1079_v44 = vmul.f32 1.442695, %v1023_v41  ;;  %v1081_v45 = vmul.f32 1.442695, %v1024_v18  ;;  %1120 = vadd.xlane.f32.xlu1 %v1119_v42  ;;  %v1025_v52 = vsub.f32 %v2016_v24, %v992_v20  ;;  %v1026_v55 = vsub.f32 %v2020_v26, %v992_v20 }
 0x3fc   : > { %v1630_v59 = vpop.eup %1629  ;;  %v1171_v46 = vpack.c.bf16 %v1628_v43, %v1624_v16 }
 0x3fd   : > { %1639 = vpow2.f32 %v1079_v44  ;;  %v1083_v4 = vmul.f32 1.442695, %v1025_v52  ;;  %v1085_v5 = vmul.f32 1.442695, %v1026_v55  ;;  %v1122_v47 = vadd.f32 %v1630_v59, %v1628_v43 }
 0x3fe   : > { %1641 = vpow2.f32 %v1081_v45  ;;  %v1172_v22 = vpack.c.bf16 %v1630_v59, %v1626_v0 }
 0x3ff   : > { %v1632_v23 = vpop.eup %1631  ;;  %1643 = vpow2.f32 %v1083_v4  ;;  %1123 = vadd.xlane.f32.xlu0 %v1122_v47 }
 0x400   : > { %v1634_v61 = vpop.eup %1633  ;;  %1645 = vpow2.f32 %v1085_v5  ;;  %1187 = vmatprep.subr.bf16.mxu0 %v1172_v22  ;;  %1510 = vmatprep.subr.bf16.mxu1 %v1172_v22  ;;  %v995_v1 = vpop.xlane.xlu1 %994 }
 0x401   : > { %1188 = vmatpush1.bf16.xpose.msra.mxu0 %v1171_v46  ;;  %1518 = vmatpush1.bf16.xpose.msra.mxu1 %v1171_v46  ;;  %v1027_v24 = vsub.f32 %v2024_v28, %v995_v1  ;;  %v1028_v26 = vsub.f32 %v2026_v29, %v995_v1  ;;  %v1125_v3 = vadd.f32 %v1634_v61, %v1632_v23 }
 0x402   : > { %v998_v48 = vpop.xlane.xlu0 %997 }
 0x403   : > { %v1636_v54 = vpop.eup %1635  ;;  %v1087_v6 = vmul.f32 1.442695, %v1027_v24  ;;  %v1089_v8 = vmul.f32 1.442695, %v1028_v26  ;;  %1126 = vadd.xlane.f32.xlu1 %v1125_v3  ;;  %v1029_v7 = vsub.f32 %v2028_v30, %v998_v48  ;;  %v1030_v9 = vsub.f32 %v2032_v32, %v998_v48 }
 0x404   : > { %v1638_v13 = vpop.eup %1637  ;;  %v1173_v56 = vpack.c.bf16 %v1636_v54, %v1632_v23 }
 0x405   : > { %1647 = vpow2.f32 %v1087_v6  ;;  %v1091_v57 = vmul.f32 1.442695, %v1029_v7  ;;  %v1093_v15 = vmul.f32 1.442695, %v1030_v9  ;;  %v1128_v19 = vadd.f32 %v1638_v13, %v1636_v54 }
 0x406   : > { %1649 = vpow2.f32 %v1089_v8  ;;  %v1174_v28 = vpack.c.bf16 %v1638_v13, %v1634_v61  ;;  %v1260_v6 = vlaneseq }
 0x407   : > { %v1640_v21 = vpop.eup %1639  ;;  %1651 = vpow2.f32 %v1091_v57  ;;  %1129 = vadd.xlane.f32.xlu0 %v1128_v19 }
 0x408   : > { %v1642_v29 = vpop.eup %1641  ;;  %1653 = vpow2.f32 %v1093_v15  ;;  %1189 = vmatprep.subr.bf16.mxu0 %v1174_v28  ;;  %1511 = vmatprep.subr.bf16.mxu1 %v1174_v28  ;;  %v1261_v8 = vshrl.u32 %v1260_v6, 7 }
 0x409   : > { %v1644_v10 = vpop.eup %1643  ;;  %1190 = vmatpush1.bf16.xpose.msra.mxu0 %v1173_v56  ;;  %1519 = vmatpush1.bf16.xpose.msra.mxu1 %v1173_v56  ;;  %v1131_v30 = vadd.f32 %v1642_v29, %v1640_v21 }
 0x40a   : > { %v1646_v32 = vpop.eup %1645  ;;  %v1175_v25 = vpack.c.bf16 %v1644_v10, %v1640_v21  ;;  %v1262_v13 = vsub.s32 0, %v1261_v8 }
 0x40b   : > { %1132 = vadd.xlane.f32.xlu1 %v1131_v30  ;;  %v1176_v11 = vpack.c.bf16 %v1646_v32, %v1642_v29  ;;  %v1134_v58 = vadd.f32 %v1646_v32, %v1644_v10  ;;  %v1269_v30 = vstv %s1268_s30 }
 0x40d   : > { %1191 = vmatprep.subr.bf16.mxu0 %v1176_v11  ;;  %1512 = vmatprep.subr.bf16.mxu1 %v1176_v11 }
 0x40e   : > { %1135 = vadd.xlane.f32.xlu0 %v1134_v58 }
 0x40f   : > { %v1648_v60 = vpop.eup %1647 }
 0x410   : > { %v1650_v27 = vpop.eup %1649 }
 0x411   : > { %v1652_v12 = vpop.eup %1651  ;;  %1192 = vmatpush1.bf16.xpose.msra.mxu0 %v1175_v25  ;;  %1520 = vmatpush1.bf16.xpose.msra.mxu1 %v1175_v25  ;;  %v1137_v31 = vadd.f32 %v1650_v27, %v1648_v60 }
 0x412   : > { %v1654_v14 = vpop.eup %1653  ;;  %v1177_v33 = vpack.c.bf16 %v1652_v12, %v1648_v60 }
 0x413   : > { %1138 = vadd.xlane.f32.xlu1 %v1137_v31  ;;  %v1178_v34 = vpack.c.bf16 %v1654_v14, %v1650_v27  ;;  %v1140_v35 = vadd.f32 %v1654_v14, %v1652_v12 }
 0x415   : > { %1193 = vmatprep.subr.bf16.mxu0 %v1178_v34  ;;  %1513 = vmatprep.subr.bf16.mxu1 %v1178_v34 }
 0x416   : > { %1141 = vadd.xlane.f32.xlu0 %v1140_v35 }
 0x419   : > { %1194 = vmatpush1.bf16.xpose.msra.mxu0 %v1177_v33  ;;  %1521 = vmatpush1.bf16.xpose.msra.mxu1 %v1177_v33 }
 0x420   : > { %1212 = vmatmul.mubr.bf16.vlgmr.msra.gmra.mrb[16].mxu0 %v1159_v36  ;;  %1220 = vmatmul.mubr.bf16.vlgmr.msra.gmra.mrb[32].mxu1 %v1161_v62 }
 0x468   : > { %v1097_v37 = vpop.xlane.xlu1 %1096 }
 0x469   : > { %1655 = vrcp.f32 %v1097_v37 }
 0x46d   : > { %v1100_v63 = vpop.xlane.xlu0 %1099 }
 0x46e   : > { %1657 = vrcp.f32 %v1100_v63 }
 0x470   : > { %v1103_v38 = vpop.xlane.xlu1 %1102 }
 0x471   : > { %1659 = vrcp.f32 %v1103_v38 }
 0x472   : > { %v1106_v16 = vpop.xlane.xlu0 %1105 }
 0x473   : > { %v1656_v39 = vpop.eup %1655  ;;  %1661 = vrcp.f32 %v1106_v16 }
 0x474   : > { %1228 = vxpose.xlu1.b32.start [1/16] (narrow) %v1656_v39, 8 }
 0x478   : > { %v1658_v40 = vpop.eup %1657  ;;  %v1109_v17 = vpop.xlane.xlu1 %1108 }
 0x479   : > { %1663 = vrcp.f32 %v1109_v17  ;;  %1229 = vxpose.xlu1.b32.cont [2/16] (narrow) %v1658_v40, 8 }
 0x47b   : > { %v1660_v0 = vpop.eup %1659 }
 0x47c   : > { %v1112_v2 = vpop.xlane.xlu0 %1111 }
 0x47d   : > { %1230 = vxpose.xlu1.b32.cont [3/16] (narrow) %v1660_v0, 8  ;;  %1665 = vrcp.f32 %v1112_v2  ;;  %v1662_v41 = vpop.eup %1661 }
 0x480   : > { %v1115_v18 = vpop.xlane.xlu1 %1114 }
 0x481   : > { %1667 = vrcp.f32 %v1115_v18  ;;  %1231 = vxpose.xlu1.b32.cont [4/16] (narrow) %v1662_v41, 8 }
 0x483   : > { %v1664_v42 = vpop.eup %1663 }
 0x484   : > { %v1118_v20 = vpop.xlane.xlu0 %1117 }
 0x485   : > { %1232 = vxpose.xlu1.b32.cont [5/16] (narrow) %v1664_v42, 8  ;;  %1669 = vrcp.f32 %v1118_v20 }
 0x487   : > { %v1666_v43 = vpop.eup %1665 }
 0x488   : > { %v1121_v44 = vpop.xlane.xlu1 %1120 }
 0x489   : > { %1671 = vrcp.f32 %v1121_v44  ;;  %1233 = vxpose.xlu1.b32.cont [6/16] (narrow) %v1666_v43, 8 }
 0x48b   : > { %v1668_v45 = vpop.eup %1667 }
 0x48c   : > { %v1124_v52 = vpop.xlane.xlu0 %1123 }
 0x48d   : > { %1234 = vxpose.xlu1.b32.cont [7/16] (narrow) %v1668_v45, 8  ;;  %1673 = vrcp.f32 %v1124_v52 }
 0x48f   : > { %v1670_v55 = vpop.eup %1669 }
 0x490   : > { %v1127_v59 = vpop.xlane.xlu1 %1126 }
 0x491   : > { %1675 = vrcp.f32 %v1127_v59  ;;  %1235 = vxpose.xlu1.b32.cont [8/16] (narrow) %v1670_v55, 8 }
 0x493   : > { %v1672_v46 = vpop.eup %1671 }
 0x494   : > { %v1130_v4 = vpop.xlane.xlu0 %1129 }
 0x495   : > { %1236 = vxpose.xlu1.b32.cont [9/16] (narrow) %v1672_v46, 8  ;;  %1677 = vrcp.f32 %v1130_v4 }
 0x497   : > { %v1674_v5 = vpop.eup %1673 }
 0x498   : > { %v1133_v47 = vpop.xlane.xlu1 %1132 }
 0x499   : > { %1679 = vrcp.f32 %v1133_v47  ;;  %1237 = vxpose.xlu1.b32.cont [10/16] (narrow) %v1674_v5, 8 }
 0x49b   : > { %v1676_v22 = vpop.eup %1675  ;;  %v1136_v23 = vpop.xlane.xlu0 %1135 }
 0x49c   : > { %1681 = vrcp.f32 %v1136_v23 }
 0x49d   : > { %1238 = vxpose.xlu1.b32.cont [11/16] (narrow) %v1676_v22, 8 }
 0x49f   : > { %v1678_v61 = vpop.eup %1677 }
 0x4a0   : > { %v1139_v1 = vpop.xlane.xlu1 %1138 }
 0x4a1   : > { %1683 = vrcp.f32 %v1139_v1  ;;  %1239 = vxpose.xlu1.b32.cont [12/16] (narrow) %v1678_v61, 8 }
 0x4a3   : > { %v1680_v24 = vpop.eup %1679  ;;  %v1142_v26 = vpop.xlane.xlu0 %1141 }
 0x4a4   : > { %1685 = vrcp.f32 %v1142_v26 }
 0x4a5   : > { %1240 = vxpose.xlu1.b32.cont [13/16] (narrow) %v1680_v24, 8 }
 0x4a6   : > { %v1682_v3 = vpop.eup %1681 }
 0x4a9   : > { %1241 = vxpose.xlu1.b32.cont [14/16] (narrow) %v1682_v3, 8 }
 0x4ab   : > { %v1684_v48 = vpop.eup %1683 }
 0x4ad   : > { %1242 = vxpose.xlu1.b32.cont [15/16] (narrow) %v1684_v48, 8 }
 0x4ae   : > { %v1686_v54 = vpop.eup %1685 }
 0x4b1   : > { %1243 = vxpose.xlu1.b32.end [16/16] (narrow) %v1686_v54, 8 }
 0x4f3   : > { %v1213_v7 = vpop.f32.mrb[16].mxu0  ;;  %v1221_v9 = vpop.f32.mrb[32].mxu1 }
 0x4f4   : > { %v1215_v56 = vpop.f32.mrb[17].mxu0  ;;  %v1223_v57 = vpop.f32.mrb[33].mxu1 }
 0x4f5   : > { %v1216_v15 = vpop.f32.mrb[18].mxu0  ;;  %v1224_v19 = vpop.f32.mrb[34].mxu1 }
 0x4f6   : > { %v1244_v28 = vpop.trf.xlu1  ;;  %v1218_v21 = vpop.f32.mrb[19].mxu0 }
 0x4f7   : > { %v1263_v29 = vrot.slane %v1244_v28, %v1262_v13  ;;  %v1226_v10 = vpop.f32.mrb[35].mxu1 }
 0x4f9   : > { %v1264_v32 = vmul.f32 %v1263_v29, %v1213_v7  ;;  %v1265_v25 = vmul.f32 %v1263_v29, %v1216_v15  ;;  %v1266_v11 = vmul.f32 %v1263_v29, %v1221_v9  ;;  %v1267_v58 = vmul.f32 %v1263_v29, %v1224_v19 }
 0x4fa   : > { %1288 = sbr.rel (!%p1846_p6) target bundleno = 1289 (0x509), region = 102 }
 0x4fb   : > { %v1270_v60 = vmul.f32 %v1269_v30, %v1264_v32  ;;  %v1271_v27 = vmul.f32 %v1269_v30, %v1265_v25  ;;  %v1272_v12 = vmul.f32 %v1269_v30, %v1266_v11  ;;  %v1273_v31 = vmul.f32 %v1269_v30, %v1267_v58 }
 0x4fd   : > { %v1274_v14 = vadd.f32 %v1270_v60, %v1901_v49  ;;  %v1275_v33 = vadd.f32 %v1271_v27, %v1904_v50  ;;  %v1276_v34 = vadd.f32 %v1272_v12, %v1907_v51  ;;  %v1277_v35 = vadd.f32 %v1273_v31, %v1912_v53 }
 0x4ff   : > { %1278 = vst [vmem:[%s1873_s19] sm:$0xff] %v1274_v14  ;;  %1279 = vst [vmem:[%s1873_s19 + $0x8] sm:$0xff] %v1275_v33 }
 0x500   : > { %1280 = vst [vmem:[%s1873_s19 + $0x10] sm:$0xff] %v1276_v34  ;;  %1281 = vst [vmem:[%s1873_s19 + $0x18] sm:$0xff] %v1277_v35 }
 0x506   : > { %v1328_v49 = vld [vmem:[%s1873_s19] sm:$0xff]  ;;  %v1330_v50 = vld [vmem:[%s1873_s19 + $0x8] sm:$0xff] }
 0x507   : > { %v1332_v51 = vld [vmem:[%s1873_s19 + $0x10] sm:$0xff]  ;;  %v1334_v36 = vld [vmem:[%s1873_s19 + $0x18] sm:$0xff]  ;;  %1329 = vst [vmem:[%s1294_s26] sm:$0xff] %v1328_v49  ;;  %1331 = vst [vmem:[%s1294_s26 + $0x10] sm:$0xff] %v1330_v50 }
 0x508   : > { %1333 = vst [vmem:[%s1294_s26 + $0x20] sm:$0xff] %v1332_v51  ;;  %1335 = vst [vmem:[%s1294_s26 + $0x30] sm:$0xff] %v1334_v36 }
 0x509 PF: > { %s20_s17 = sadd.s32 1, %s1741_s17   ;;  %s2119_s11 = smov %s1721_s12 }
 0x50a   : > { %p17_p0 = scmp.ge.s32.totalorder %s20_s17, 6   ;;  %s2120_s12 = smov %s1854_s25 }
 0x50b   : > { %s2121_s13 = smov %s1733_s15  ;;  %s2122_s14 = smov %s1737_s16 }
 0x50c   : > { %s2123_s15 = smov %s2126_s8  ;;  %s2124_s16 = smov %s2130_s18 }
 0x50d   :  { %19 = sbr.rel (!%p17_p0) target bundleno = 6 (0x6), region = 174 }

</bundles_post_ra>
